<compile_context>
chip_gen: v5e
topology: v5e:2x2
jax: 0.10.0
libtpu: 0.0.40
codegen_flags: <defaults>
</compile_context>

<pallas_src>
import math
import jax
import jax.numpy as jnp
from jax.experimental import pallas as pl
from jax.experimental.pallas import tpu as pltpu

BN_EPS = 1e-5


# ------------------------------ kernel ---------------------------------------


def loco_kernel(x_ref,
                w1_ref,        # (in_dim, L)   bf16   (BN1 folded)
                wtrunk_ref,    # (L, 3L)       bf16   [ws1 | ws2 | w3] (BN folded)
                btrunk_ref,    # (1, 4L)       f32    [b1 | bs1 | bs2 | b3]
                wout_ref,      # (2L, out_dim) bf16   blockdiag(w_fin, w_aux)
                bout_ref,      # (1, out_dim)  f32    [b_fin | b_aux]
                out_ref):      # (tb, out_dim) f32
    L = w1_ref.shape[1]

    def lin_relu(h, w_bf16, b_f32):
        y = jnp.dot(h.astype(jnp.bfloat16), w_bf16,
                    preferred_element_type=jnp.float32) + b_f32
        return jnp.maximum(y, 0.0)

    x = x_ref[...]

    # trunk: relu(BN1(w1 x))   (BN folded into w1/b1)
    y = lin_relu(x, w1_ref[...], btrunk_ref[:, 0:L])

    # one MyLinearSimple residual stage (num_stage = 1)
    t = lin_relu(y, wtrunk_ref[:, 0:L],       btrunk_ref[:, L:2 * L])
    t = lin_relu(t, wtrunk_ref[:, L:2 * L],   btrunk_ref[:, 2 * L:3 * L])
    y = y + t

    # final trunk layer
    z = lin_relu(y, wtrunk_ref[:, 2 * L:3 * L], btrunk_ref[:, 3 * L:4 * L])

    # fused heads: [z | y] @ blockdiag(w_fin, w_aux) + [b_fin | b_aux]
    # == torch.cat((w_fin(z), w_aux(y)), dim=1); single MXU pass, single store.
    zy = jnp.concatenate([z, y], axis=-1).astype(jnp.bfloat16)
    out = jnp.dot(zy, wout_ref[...], preferred_element_type=jnp.float32)
    out_ref[...] = (out + bout_ref[...]).astype(out_ref.dtype)


# ------------------------------ wrapper ---------------------------------------


def _pick_batch_tile(batch):
    """Largest divisor tile, capped at batch//2 (grid >= 2 -> both v7x TCs)."""
    cap = batch // 2 if batch >= 16 else batch
    for tb in (4096, 2048, 1024, 512, 256, 128, 64, 32, 16, 8):
        if tb <= cap and batch % tb == 0:
            return tb
    return batch  # batch < 16 and a multiple of 8


def loco_forward(x, params):
    """params = [w1_bf16, W_trunk_bf16, B_trunk_f32, W_out_bf16, b_out_f32]."""
    B, in_dim = x.shape
    out_dim = params[3].shape[1]

    # Pad batch to a sublane multiple on the host (avoids odd-shaped blocks).
    Bp = ((B + 7) // 8) * 8
    if Bp != B:
        x = jnp.pad(x, ((0, Bp - B), (0, 0)))

    tb = _pick_batch_tile(Bp)
    grid = (Bp // tb,)

    def resident(p):
        # whole array as one block, same block every grid step -> VMEM-resident
        zeros = (0,) * p.ndim
        return pl.BlockSpec(p.shape, lambda i, z=zeros: z)

    in_specs = [pl.BlockSpec((tb, in_dim), lambda i: (i, 0))]
    in_specs += [resident(p) for p in params]

    out = pl.pallas_call(
        loco_kernel,
        out_shape=jax.ShapeDtypeStruct((Bp, out_dim), jnp.float32),
        grid=grid,
        in_specs=in_specs,
        out_specs=pl.BlockSpec((tb, out_dim), lambda i: (i, 0)),
        compiler_params=pltpu.CompilerParams(
            dimension_semantics=("parallel",),      # shard grid over v7x's 2 TCs
            vmem_limit_bytes=32 * 1024 * 1024),     # footprint is only a few MB
    )(x, *params)

    return out[:B]


# ----------------- parameter init (raw, PyTorch-like) + folding ---------------


def _init_linear(key, fan_in, fan_out):
    kw, kb = jax.random.split(key)
    bound = 1.0 / math.sqrt(fan_in)
    w = jax.random.uniform(kw, (fan_in, fan_out), jnp.float32, -bound, bound)
    b = jax.random.uniform(kb, (1, fan_out), jnp.float32, -bound, bound)
    return w, b


def _init_bn(key, features):
    kg, kb, km, kv = jax.random.split(key, 4)
    gamma = 1.0 + 0.1 * jax.random.normal(kg, (1, features))
    beta = 0.1 * jax.random.normal(kb, (1, features))
    mean = 0.1 * jax.random.normal(km, (1, features))
    var = 1.0 + 0.1 * jax.random.uniform(kv, (1, features))
    return jnp.concatenate([gamma, beta, mean, var], axis=0).astype(jnp.float32)


def init_loco_params(key, input_size, linear_size, output_size):
    ks = jax.random.split(key, 9)
    w1, b1 = _init_linear(ks[0], input_size, linear_size)
    bn1 = _init_bn(ks[1], linear_size)
    ws1, bs1 = _init_linear(ks[2], linear_size, linear_size)
    bns1 = _init_bn(ks[3], linear_size)
    ws2, bs2 = _init_linear(ks[4], linear_size, linear_size)
    bns2 = _init_bn(ks[5], linear_size)
    w3, b3 = _init_linear(ks[6], linear_size, linear_size)
    bn3 = _init_bn(ks[7], linear_size)
    k_aux, k_fin = jax.random.split(ks[8])
    w_aux, b_aux = _init_linear(k_aux, linear_size, 1)
    w_fin, b_fin = _init_linear(k_fin, linear_size, output_size - 1)
    return [w1, b1, bn1,
            ws1, bs1, bns1,
            ws2, bs2, bns2,
            w3, b3, bn3,
            w_aux, b_aux,
            w_fin, b_fin]


def fold_params(raw):
    """Fold eval-mode BN into each Linear, pack weights/biases, cast to bf16.

    Returns [w1 (in,L) bf16, W_trunk (L,3L) bf16, B_trunk (1,4L) f32,
             W_out (2L,out) bf16, b_out (1,out) f32].
    """
    (w1, b1, bn1, ws1, bs1, bns1, ws2, bs2, bns2,
     w3, b3, bn3, w_aux, b_aux, w_fin, b_fin) = raw

    def fold(w, b, bn):
        scale = bn[0:1] * jax.lax.rsqrt(bn[3:4] + BN_EPS)   # gamma / sqrt(var+eps)
        return w * scale, (b - bn[2:3]) * scale + bn[1:2]

    w1f, b1f = fold(w1, b1, bn1)
    ws1f, bs1f = fold(ws1, bs1, bns1)
    ws2f, bs2f = fold(ws2, bs2, bns2)
    w3f, b3f = fold(w3, b3, bn3)

    L = w1f.shape[1]
    nf = w_fin.shape[1]

    w_trunk = jnp.concatenate([ws1f, ws2f, w3f], axis=1)            # (L, 3L)
    b_trunk = jnp.concatenate([b1f, bs1f, bs2f, b3f], axis=1)       # (1, 4L)

    # Block-diagonal fused head: rows 0:L -> fin columns, rows L:2L -> aux col.
    w_out = jnp.zeros((2 * L, nf + 1), jnp.float32)
    w_out = w_out.at[:L, :nf].set(w_fin)
    w_out = w_out.at[L:, nf:].set(w_aux)
    b_out = jnp.concatenate([b_fin, b_aux], axis=1)                  # (1, nf+1)

    return [w1f.astype(jnp.bfloat16),
            w_trunk.astype(jnp.bfloat16),
            b_trunk.astype(jnp.float32),
            w_out.astype(jnp.bfloat16),          # TODO(synk): keep bf16; fp8 needs an accuracy study
            b_out.astype(jnp.float32)]


# ---------------------- pure-JAX reference (un-folded, f32) -------------------


def loco_reference(x, raw):
    (w1, b1, bn1, ws1, bs1, bns1, ws2, bs2, bns2,
     w3, b3, bn3, w_aux, b_aux, w_fin, b_fin) = raw

    def bn_relu(y, bn):
        return jnp.maximum(
            (y - bn[2:3]) * jax.lax.rsqrt(bn[3:4] + BN_EPS) * bn[0:1] + bn[1:2], 0.0)

    y = bn_relu(x @ w1 + b1, bn1)
    t = bn_relu(y @ ws1 + bs1, bns1)
    t = bn_relu(t @ ws2 + bs2, bns2)
    y = y + t
    aux = y @ w_aux + b_aux
    y = bn_relu(y @ w3 + b3, bn3)
    fin = y @ w_fin + b_fin
    return jnp.concatenate([fin, aux], axis=1)


if __name__ == "__main__":
    # input_size=8 (stereo pair of 4), linear_size=128 (lane-aligned),
    # output_size=2, num_stage=1, batch=64 -> tb=32, grid=(2,) so the parallel
    # batch axis has work for both v7x TensorCores.
    B, INPUT_SIZE, LINEAR_SIZE, OUTPUT_SIZE = 64, 8, 128, 2

    key = jax.random.PRNGKey(0)
    kx, kp = jax.random.split(key)
    x = jax.random.normal(kx, (B, INPUT_SIZE), jnp.float32)

    raw_params = init_loco_params(kp, INPUT_SIZE, LINEAR_SIZE, OUTPUT_SIZE)
    folded = fold_params(raw_params)

    out = jax.block_until_ready(loco_forward(x, folded))

    ref = loco_reference(x, raw_params)
    assert out.shape == (B, OUTPUT_SIZE), out.shape
    # bf16 matmul operands (f32 accumulation) -> bf16-appropriate tolerance.
    err = float(jnp.max(jnp.abs(out - ref)))
    assert err < 5e-2, err

    print("KERNEL_OK")
</pallas_src>

<mosaic_0001>
module attributes {stable_mosaic.version = 11 : i64} {
  func.func @loco_kernel(%arg0: i32, %arg1: memref<32x8xf32, #tpu.memory_space<vmem>>, %arg2: memref<8x128xbf16, #tpu.memory_space<vmem>>, %arg3: memref<128x384xbf16, #tpu.memory_space<vmem>>, %arg4: memref<1x512xf32, #tpu.memory_space<vmem>>, %arg5: memref<256x2xbf16, #tpu.memory_space<vmem>>, %arg6: memref<1x2xf32, #tpu.memory_space<vmem>>, %arg7: memref<32x2xf32, #tpu.memory_space<vmem>>) attributes {dimension_semantics = [#tpu.dimension_semantics<parallel>], iteration_bounds = array<i64: 2>, scalar_prefetch = 0 : i64, scratch_operands = 0 : i64, tpu.core_type = #tpu.core_type<tc>, window_params = [{transform_indices = @transform_0, window_bounds = array<i64: 32, 8>}, {pipeline_mode = #tpu.pipeline_mode<synchronous>, transform_indices = @transform_1, window_bounds = array<i64: 8, 128>}, {pipeline_mode = #tpu.pipeline_mode<synchronous>, transform_indices = @transform_2, window_bounds = array<i64: 128, 384>}, {pipeline_mode = #tpu.pipeline_mode<synchronous>, transform_indices = @transform_3, window_bounds = array<i64: 1, 512>}, {pipeline_mode = #tpu.pipeline_mode<synchronous>, transform_indices = @transform_4, window_bounds = array<i64: 256, 2>}, {pipeline_mode = #tpu.pipeline_mode<synchronous>, transform_indices = @transform_5, window_bounds = array<i64: 1, 2>}, {transform_indices = @transform_6, window_bounds = array<i64: 32, 2>}]} {
    %c0 = arith.constant 0 : index
    %c0_0 = arith.constant 0 : index
    %0 = vector.load %arg1[%c0, %c0_0] : memref<32x8xf32, #tpu.memory_space<vmem>>, vector<32x8xf32>
    %c0_1 = arith.constant 0 : index
    %c0_2 = arith.constant 0 : index
    %1 = vector.load %arg2[%c0_1, %c0_2] : memref<8x128xbf16, #tpu.memory_space<vmem>>, vector<8x128xbf16>
    %c0_3 = arith.constant 0 : index
    %c0_4 = arith.constant 0 : index
    %2 = vector.load %arg4[%c0_3, %c0_4] : memref<1x512xf32, #tpu.memory_space<vmem>>, vector<1x128xf32>
    %3 = arith.truncf %0 : vector<32x8xf32> to vector<32x8xbf16>
    %cst = arith.constant dense<0.000000e+00> : vector<32x128xf32>
    %4 = tpu.matmul %3, %1, %cst {dimension_numbers = #tpu.dot_dimension_numbers<[1], [0], [0], [1], [0, 0, 1, 1], [], []>} : vector<32x8xbf16>, vector<8x128xbf16>, vector<32x128xf32> -> vector<32x128xf32>
    %5 = vector.broadcast %2 : vector<1x128xf32> to vector<32x128xf32>
    %6 = arith.addf %4, %5 : vector<32x128xf32>
    %cst_5 = arith.constant 0.000000e+00 : f32
    %7 = vector.broadcast %cst_5 : f32 to vector<32x128xf32>
    %8 = arith.maximumf %6, %7 : vector<32x128xf32>
    %c0_6 = arith.constant 0 : index
    %c0_7 = arith.constant 0 : index
    %9 = vector.load %arg3[%c0_6, %c0_7] : memref<128x384xbf16, #tpu.memory_space<vmem>>, vector<128x128xbf16>
    %c0_8 = arith.constant 0 : index
    %c128 = arith.constant 128 : index
    %10 = vector.load %arg4[%c0_8, %c128] : memref<1x512xf32, #tpu.memory_space<vmem>>, vector<1x128xf32>
    %11 = arith.truncf %8 : vector<32x128xf32> to vector<32x128xbf16>
    %cst_9 = arith.constant dense<0.000000e+00> : vector<32x128xf32>
    %12 = tpu.matmul %11, %9, %cst_9 {dimension_numbers = #tpu.dot_dimension_numbers<[1], [0], [0], [1], [0, 0, 1, 1], [], []>} : vector<32x128xbf16>, vector<128x128xbf16>, vector<32x128xf32> -> vector<32x128xf32>
    %13 = vector.broadcast %10 : vector<1x128xf32> to vector<32x128xf32>
    %14 = arith.addf %12, %13 : vector<32x128xf32>
    %cst_10 = arith.constant 0.000000e+00 : f32
    %15 = vector.broadcast %cst_10 : f32 to vector<32x128xf32>
    %16 = arith.maximumf %14, %15 : vector<32x128xf32>
    %c0_11 = arith.constant 0 : index
    %c128_12 = arith.constant 128 : index
    %17 = vector.load %arg3[%c0_11, %c128_12] : memref<128x384xbf16, #tpu.memory_space<vmem>>, vector<128x128xbf16>
    %c0_13 = arith.constant 0 : index
    %c256 = arith.constant 256 : index
    %18 = vector.load %arg4[%c0_13, %c256] : memref<1x512xf32, #tpu.memory_space<vmem>>, vector<1x128xf32>
    %19 = arith.truncf %16 : vector<32x128xf32> to vector<32x128xbf16>
    %cst_14 = arith.constant dense<0.000000e+00> : vector<32x128xf32>
    %20 = tpu.matmul %19, %17, %cst_14 {dimension_numbers = #tpu.dot_dimension_numbers<[1], [0], [0], [1], [0, 0, 1, 1], [], []>} : vector<32x128xbf16>, vector<128x128xbf16>, vector<32x128xf32> -> vector<32x128xf32>
    %21 = vector.broadcast %18 : vector<1x128xf32> to vector<32x128xf32>
    %22 = arith.addf %20, %21 : vector<32x128xf32>
    %cst_15 = arith.constant 0.000000e+00 : f32
    %23 = vector.broadcast %cst_15 : f32 to vector<32x128xf32>
    %24 = arith.maximumf %22, %23 : vector<32x128xf32>
    %25 = arith.addf %8, %24 : vector<32x128xf32>
    %c0_16 = arith.constant 0 : index
    %c256_17 = arith.constant 256 : index
    %26 = vector.load %arg3[%c0_16, %c256_17] : memref<128x384xbf16, #tpu.memory_space<vmem>>, vector<128x128xbf16>
    %c0_18 = arith.constant 0 : index
    %c384 = arith.constant 384 : index
    %27 = vector.load %arg4[%c0_18, %c384] : memref<1x512xf32, #tpu.memory_space<vmem>>, vector<1x128xf32>
    %28 = arith.truncf %25 : vector<32x128xf32> to vector<32x128xbf16>
    %cst_19 = arith.constant dense<0.000000e+00> : vector<32x128xf32>
    %29 = tpu.matmul %28, %26, %cst_19 {dimension_numbers = #tpu.dot_dimension_numbers<[1], [0], [0], [1], [0, 0, 1, 1], [], []>} : vector<32x128xbf16>, vector<128x128xbf16>, vector<32x128xf32> -> vector<32x128xf32>
    %30 = vector.broadcast %27 : vector<1x128xf32> to vector<32x128xf32>
    %31 = arith.addf %29, %30 : vector<32x128xf32>
    %cst_20 = arith.constant 0.000000e+00 : f32
    %32 = vector.broadcast %cst_20 : f32 to vector<32x128xf32>
    %33 = arith.maximumf %31, %32 : vector<32x128xf32>
    %34 = tpu.concatenate %33, %25 in 1 : vector<32x128xf32>, vector<32x128xf32> -> vector<32x256xf32>
    %35 = arith.truncf %34 : vector<32x256xf32> to vector<32x256xbf16>
    %c0_21 = arith.constant 0 : index
    %c0_22 = arith.constant 0 : index
    %36 = vector.load %arg5[%c0_21, %c0_22] : memref<256x2xbf16, #tpu.memory_space<vmem>>, vector<256x2xbf16>
    %cst_23 = arith.constant dense<0.000000e+00> : vector<32x2xf32>
    %37 = tpu.matmul %35, %36, %cst_23 {dimension_numbers = #tpu.dot_dimension_numbers<[1], [0], [0], [1], [0, 0, 1, 1], [], []>} : vector<32x256xbf16>, vector<256x2xbf16>, vector<32x2xf32> -> vector<32x2xf32>
    %c0_24 = arith.constant 0 : index
    %c0_25 = arith.constant 0 : index
    %38 = vector.load %arg6[%c0_24, %c0_25] : memref<1x2xf32, #tpu.memory_space<vmem>>, vector<1x2xf32>
    %39 = vector.broadcast %38 : vector<1x2xf32> to vector<32x2xf32>
    %40 = arith.addf %37, %39 : vector<32x2xf32>
    %c0_26 = arith.constant 0 : index
    %c0_27 = arith.constant 0 : index
    %41 = vector.load %arg7[%c0_26, %c0_27] : memref<32x2xf32, #tpu.memory_space<vmem>>, vector<32x2xf32>
    tpu.vector_store %arg7[%c0_26, %c0_27], %40 {strides = array<i32>} : memref<32x2xf32, #tpu.memory_space<vmem>>, vector<32x2xf32>,
    return
  }
  func.func @transform_0(%arg0: i32) -> (i32, i32) {
    %c0_i32 = arith.constant 0 : i32
    %c0_i32_0 = arith.constant 0 : i32
    return %arg0, %c0_i32 : i32, i32
  }
  func.func @transform_1(%arg0: i32) -> (i32, i32) {
    %c0_i32 = arith.constant 0 : i32
    %c0_i32_0 = arith.constant 0 : i32
    %c0_i32_1 = arith.constant 0 : i32
    return %c0_i32, %c0_i32_0 : i32, i32
  }
  func.func @transform_2(%arg0: i32) -> (i32, i32) {
    %c0_i32 = arith.constant 0 : i32
    %c0_i32_0 = arith.constant 0 : i32
    %c0_i32_1 = arith.constant 0 : i32
    return %c0_i32, %c0_i32_0 : i32, i32
  }
  func.func @transform_3(%arg0: i32) -> (i32, i32) {
    %c0_i32 = arith.constant 0 : i32
    %c0_i32_0 = arith.constant 0 : i32
    %c0_i32_1 = arith.constant 0 : i32
    return %c0_i32, %c0_i32_0 : i32, i32
  }
  func.func @transform_4(%arg0: i32) -> (i32, i32) {
    %c0_i32 = arith.constant 0 : i32
    %c0_i32_0 = arith.constant 0 : i32
    %c0_i32_1 = arith.constant 0 : i32
    return %c0_i32, %c0_i32_0 : i32, i32
  }
  func.func @transform_5(%arg0: i32) -> (i32, i32) {
    %c0_i32 = arith.constant 0 : i32
    %c0_i32_0 = arith.constant 0 : i32
    %c0_i32_1 = arith.constant 0 : i32
    return %c0_i32, %c0_i32_0 : i32, i32
  }
  func.func @transform_6(%arg0: i32) -> (i32, i32) {
    %c0_i32 = arith.constant 0 : i32
    %c0_i32_0 = arith.constant 0 : i32
    return %arg0, %c0_i32 : i32, i32
  }
}

</mosaic_0001>

<bundles_post_ra>
// kernel: tpu_custom_call.1
= control target key start
LH: loop header
LB: loop body
LE: loop exit
PB: predicated region body
PF: predicated region fallthrough
CT: control target
= control target key end

     0   :  { %s1094_s21 = smov 0   ;;  %s1360_s0 = inlined_call_operand.vmem [shape: f32[64,8], index: 0, kind: input, shape index: {}]   ;;  %s1361_s1 = inlined_call_operand.vmem [shape: bf16[8,128], index: 1, kind: input, shape index: {}]   ;;  %s1362_s2 = inlined_call_operand.vmem [shape: bf16[128,384], index: 2, kind: input, shape index: {}]   ;;  %s1363_s3 = inlined_call_operand.vmem [shape: f32[1,512], index: 3, kind: input, shape index: {}]   ;;  %s1364_s4 = inlined_call_operand.vmem [shape: bf16[256,2], index: 4, kind: input, shape index: {}]   ;;  %s1365_s5 = inlined_call_operand.vmem [shape: f32[1,2], index: 5, kind: input, shape index: {}]   ;;  %s1366_s6 = inlined_call_operand.vmem [shape: f32[64,2], index: 6, kind: output, shape index: {}]  }
   0x1 LB: > { %s817_s22 = sadd.s32 4294967295, %s1057_s21   ;;  %p821_p0 = scmp.ge.s32.totalorder %s1057_s21, 1  ;;  %s1057_s21 = sphi %s1094_s21, %s16_s21  }
   0x2   : > { %p213_p1 = scmp.lt.s32.totalorder %s1057_s21, 3 }
   0x4   : > { %p214_p2 = pnand %p821_p0, %p213_p1 }
   0x5   : > { %s822_s25 = sshll.u32 (!%p214_p2), %s817_s22, 2 }
   0x6   : > { %217 = sbr.rel (%p214_p2) target bundleno = 746 (0x2ea), region = 44  ;;  %p244_p3 = scmp.lt.s32.totalorder (!%p214_p2), %s822_s25, 7 }
   0xb   : > { %v260_v0 = vld [vmem:[%s1361_s1] sm:$0xf]  ;;  %vm274_vm0 = vcmask 1043456   ;;  %v858_v2 = vld [vmem:[%s1362_s2 + $0xa8] sm:$0xf]  ;;  %s1368_s25 = smov (!%p244_p3, %s822_s25), 7 }
   0xc   : > { %v276_v1 = vsel %vm274_vm0, %v260_v0, 0  ;;  %v997_v3 = vld [vmem:[%s1362_s2 + $0xb0] sm:$0xf0]  ;;  %v854_v5 = vld [vmem:[%s1362_s2 + $0x90] sm:$0xf]  ;;  %s823_s14 = sshll.u32 %s1368_s25, 3 }
   0xd   : > { %285 = vmatpush.bf16.msra.mxu0 %v276_v1  ;;  %v859_v4 = vor.u32 %v997_v3, %v858_v2  ;;  %v996_v6 = vld [vmem:[%s1362_s2 + $0x98] sm:$0xf0]  ;;  %v850_v8 = vld [vmem:[%s1362_s2 + $0x78] sm:$0xf]  ;;  %v995_v9 = vld [vmem:[%s1362_s2 + $0x80] sm:$0xf0]  ;;  %s247_s17 = scalar_lea.vmem %s1360_s0, %s823_s14  ;;  %s253_s20 = scalar_lea.vmem %s1366_s6, %s823_s14 }
   0xe   : > { %v855_v7 = vor.u32 %v996_v6, %v854_v5  ;;  %v256_v10 = vld [vmem:[%s247_s17] sm:$0xff]  ;;  %v257_v11 = vld [vmem:[%s247_s17 + $0x8] sm:$0xff]  ;;  %vm267_vm1 = vcmask 64512   ;;  %v851_v13 = vor.u32 %v995_v9, %v850_v8  ;;  %v258_v17 = vld [vmem:[%s247_s17 + $0x10] sm:$0xff]  ;;  %vm756_vm2 = vcmask 15360  }
   0xf   : > { %371 = vmatpush.bf16.msra.mxu1 %v859_v4  ;;  %v262_v12 = vpack.c.bf16 %v257_v11, %v256_v10  ;;  %v846_v14 = vld [vmem:[%s1362_s2 + $0x60] sm:$0xf]  ;;  %v994_v15 = vld [vmem:[%s1362_s2 + $0x68] sm:$0xf0]  ;;  %v259_v18 = vld [vmem:[%s247_s17 + $0x18] sm:$0xff] }
  0x10   : > { %v847_v16 = vor.u32 %v994_v15, %v846_v14  ;;  %v263_v19 = vpack.c.bf16 %v259_v18, %v258_v17  ;;  %v842_v20 = vld [vmem:[%s1362_s2 + $0x48] sm:$0xf]  ;;  %v993_v21 = vld [vmem:[%s1362_s2 + $0x50] sm:$0xf0]  ;;  %v838_v23 = vld [vmem:[%s1362_s2 + $0x30] sm:$0xf] }
  0x11   : > { %826 = vmatmul.msk.bf16.vlgmr.msra.gmra.mxu0 %vm267_vm1, %v262_v12  ;;  %v843_v22 = vor.u32 %v993_v21, %v842_v20  ;;  %v992_v24 = vld [vmem:[%s1362_s2 + $0x38] sm:$0xf0]  ;;  %v834_v26 = vld [vmem:[%s1362_s2 + $0x18] sm:$0xf]  ;;  %v991_v27 = vld [vmem:[%s1362_s2 + $0x20] sm:$0xf0] }
  0x12   : > { %v839_v25 = vor.u32 %v992_v24, %v838_v23  ;;  %v835_v28 = vor.u32 %v991_v27, %v834_v26  ;;  %v830_v29 = vld [vmem:[%s1362_s2] sm:$0xf]  ;;  %v990_v30 = vld [vmem:[%s1362_s2 + $0x8] sm:$0xf0]  ;;  %v1005_v33 = vld [vmem:[%s1362_s2 + $0xb4] sm:$0xf0] }
  0x13   : > { %372 = vmatpush.bf16.msra.mxu1 %v855_v7  ;;  %v831_v31 = vor.u32 %v990_v30, %v830_v29  ;;  %v890_v32 = vld [vmem:[%s1362_s2 + $0xac] sm:$0xf]  ;;  %v886_v34 = vld [vmem:[%s1362_s2 + $0x94] sm:$0xf]  ;;  %v1004_v37 = vld [vmem:[%s1362_s2 + $0x9c] sm:$0xf0] }
  0x14   : > { %v891_v36 = vor.u32 %v1005_v33, %v890_v32  ;;  %v887_v38 = vor.u32 %v1004_v37, %v886_v34  ;;  %v1046_v39 = vld [vmem:[%s1363_s3] ss:$0 sm:$0xff]  ;;  %v882_v40 = vld [vmem:[%s1362_s2 + $0x7c] sm:$0xf]  ;;  %v1003_v41 = vld [vmem:[%s1362_s2 + $0x84] sm:$0xf0] }
  0x15   : > { %v883_v42 = vor.u32 %v1003_v41, %v882_v40  ;;  %v878_v44 = vld [vmem:[%s1362_s2 + $0x64] sm:$0xf]  ;;  %v1002_v45 = vld [vmem:[%s1362_s2 + $0x6c] sm:$0xf0]  ;;  %v874_v59 = vld [vmem:[%s1362_s2 + $0x4c] sm:$0xf] }
  0x16   : > { %464 = vmatpush.bf16.msra.mxu2 %v891_v36  ;;  %v879_v48 = vor.u32 %v1002_v45, %v878_v44  ;;  %v1001_v60 = vld [vmem:[%s1362_s2 + $0x54] sm:$0xf0]  ;;  %v870_v62 = vld [vmem:[%s1362_s2 + $0x34] sm:$0xf]  ;;  %v1000_v63 = vld [vmem:[%s1362_s2 + $0x3c] sm:$0xf0] }
  0x17   : > { %373 = vmatpush.bf16.msra.mxu1 %v851_v13  ;;  %v875_v61 = vor.u32 %v1001_v60, %v874_v59  ;;  %v871_v0 = vor.u32 %v1000_v63, %v870_v62  ;;  %v866_v1 = vld [vmem:[%s1362_s2 + $0x1c] sm:$0xf]  ;;  %v999_v2 = vld [vmem:[%s1362_s2 + $0x24] sm:$0xf0]  ;;  %v862_v4 = vld [vmem:[%s1362_s2 + $0x4] sm:$0xf] }
  0x18   : > { %v867_v3 = vor.u32 %v999_v2, %v866_v1  ;;  %v998_v5 = vld [vmem:[%s1362_s2 + $0xc] sm:$0xf0]  ;;  %v1013_v8 = vld [vmem:[%s1362_s2 + $0xb8] sm:$0xf0]  ;;  %v918_v12 = vld [vmem:[%s1362_s2 + $0x98] sm:$0xf] }
  0x19   : > { %v863_v6 = vor.u32 %v998_v5, %v862_v4  ;;  %v922_v7 = vld [vmem:[%s1362_s2 + $0xb0] sm:$0xf]  ;;  %v1029_v9 = vld [vmem:[%s1364_s4 + $0x78] sm:$0xff]  ;;  %v1012_v13 = vld [vmem:[%s1362_s2 + $0xa0] sm:$0xf0] }
  0x1a   : > { %465 = vmatpush.bf16.msra.mxu2 %v887_v38  ;;  %v923_v11 = vor.u32 %v1013_v8, %v922_v7  ;;  %v1028_v14 = vld [vmem:[%s1364_s4 + $0x70] sm:$0xff]  ;;  %v919_v15 = vor.u32 %v1012_v13, %v918_v12  ;;  %v914_v17 = vld [vmem:[%s1362_s2 + $0x80] sm:$0xf]  ;;  %v1011_v18 = vld [vmem:[%s1362_s2 + $0x88] sm:$0xf0] }
  0x1b   : > { %374 = vmatpush.bf16.msra.mxu1 %v847_v16  ;;  %v1047_v16 = vld [vmem:[%s1363_s3 + $0x1] ss:$0 sm:$0xff]  ;;  %v915_v20 = vor.u32 %v1011_v18, %v914_v17  ;;  %v1010_v23 = vld [vmem:[%s1362_s2 + $0x70] sm:$0xf0]  ;;  %v906_v38 = vld [vmem:[%s1362_s2 + $0x50] sm:$0xf] }
  0x1c   : > { %561 = vmatpush.bf16.msra.mxu3 %v923_v11  ;;  %v1026_v26 = vld [vmem:[%s1364_s4 + $0x60] sm:$0xff]  ;;  %v1025_v41 = vld [vmem:[%s1364_s4 + $0x58] sm:$0xff]  ;;  %v1006_v59 = vld [vmem:[%s1362_s2 + $0x10] sm:$0xf0] }
  0x1d   : > { %v1008_v44 = vld [vmem:[%s1362_s2 + $0x40] sm:$0xf0]  ;;  %v1048_v63 = vld [vmem:[%s1363_s3 + $0x2] ss:$0 sm:$0xff]  ;;  %v1020_v1 = vld [vmem:[%s1364_s4 + $0x30] sm:$0xff] }
  0x1e   : > { %466 = vmatpush.bf16.msra.mxu2 %v883_v42  ;;  %v902_v42 = vld [vmem:[%s1362_s2 + $0x38] sm:$0xf] }
  0x1f   : > { %375 = vmatpush.bf16.msra.mxu1 %v843_v22  ;;  %v910_v22 = vld [vmem:[%s1362_s2 + $0x68] sm:$0xf]  ;;  %v903_v45 = vor.u32 %v1008_v44, %v902_v42 }
  0x20   : > { %562 = vmatpush.bf16.msra.mxu3 %v919_v15  ;;  %v911_v27 = vor.u32 %v1010_v23, %v910_v22 }
  0x21   : > { %827 = vmatmul.msk.bf16.gmra.mxu0 %vm267_vm1, %v263_v19  ;;  %v1027_v19 = vld [vmem:[%s1364_s4 + $0x68] sm:$0xff] }
  0x22   : > { %467 = vmatpush.bf16.msra.mxu2 %v879_v48  ;;  %v898_v48 = vld [vmem:[%s1362_s2 + $0x20] sm:$0xf] }
  0x23   : > { %376 = vmatpush.bf16.msra.mxu1 %v839_v25 }
  0x24   : > { %563 = vmatpush.bf16.msra.mxu3 %v915_v20 }
  0x26   : > { %468 = vmatpush.bf16.msra.mxu2 %v875_v61  ;;  %v1022_v61 = vld [vmem:[%s1364_s4 + $0x40] sm:$0xff] }
  0x27   : > { %377 = vmatpush.bf16.msra.mxu1 %v835_v28 }
  0x28   : > { %564 = vmatpush.bf16.msra.mxu3 %v911_v27 }
  0x2a   : > { %469 = vmatpush.bf16.msra.mxu2 %v871_v0  ;;  %v1021_v0 = vld [vmem:[%s1364_s4 + $0x38] sm:$0xff] }
  0x2b   : > { %378 = vmatpush.bf16.msra.mxu1 %v831_v31  ;;  %718 = vmatpush.bf16.msrb.mxu0 %v1021_v0 }
  0x2e   : > { %470 = vmatpush.bf16.msra.mxu2 %v867_v3  ;;  %v1019_v3 = vld [vmem:[%s1364_s4 + $0x28] sm:$0xff] }
  0x2f   : > { %737 = vmatpush.bf16.msrb.mxu1 %v1029_v9  ;;  %719 = vmatpush.bf16.msrb.mxu0 %v1020_v1 }
  0x32   : > { %471 = vmatpush.bf16.msra.mxu2 %v863_v6 }
  0x33   : > { %738 = vmatpush.bf16.msrb.mxu1 %v1028_v14  ;;  %720 = vmatpush.bf16.msrb.mxu0 %v1019_v3 }
  0x36   : > { %1030 = vmatpush.bf16.msrb.mxu2 %v1029_v9 }
  0x37   : > { %739 = vmatpush.bf16.msrb.mxu1 %v1027_v19 }
  0x3a   : > { %1031 = vmatpush.bf16.msrb.mxu2 %v1028_v14 }
  0x3b   : > { %740 = vmatpush.bf16.msrb.mxu1 %v1026_v26 }
  0x3e   : > { %1032 = vmatpush.bf16.msrb.mxu2 %v1027_v19 }
  0x3f   : > { %741 = vmatpush.bf16.msrb.mxu1 %v1025_v41 }
  0x42   : > { %1033 = vmatpush.bf16.msrb.mxu2 %v1026_v26 }
  0x46   : > { %1034 = vmatpush.bf16.msrb.mxu2 %v1025_v41 }
  0x8e   : > { %v287_v35 = vpop.f32.mrf.mxu0 }
  0x8f   : > { %v1182_v43 = vadd.f32 %v1046_v39, %v287_v35 }
  0x91   : > { %v297_v49 = vmax.f32 %v1182_v43, 0.0 }
  0x96   : > { %v289_v46 = vpop.f32.mrf.mxu0 }
  0x97   : > { %v1190_v47 = vadd.f32 %v1046_v39, %v289_v46  ;;  %v1024_v46 = vld [vmem:[%s1364_s4 + $0x50] sm:$0xff] }
  0x98   : > { %742 = vmatpush.bf16.msrb.mxu1 %v1024_v46  ;;  %1035 = vmatpush.bf16.msrb.mxu2 %v1024_v46 }
  0x99   : > { %v298_v50 = vmax.f32 %v1190_v47, 0.0  ;;  %v1018_v47 = vld [vmem:[%s1364_s4 + $0x20] sm:$0xff] }
  0x9a   : > { %721 = vmatpush.bf16.msrb.mxu0 %v1018_v47 }
  0x9b   : > { %v318_v51 = vpack.c.bf16 %v298_v50, %v297_v49 }
  0x9d   : > { %379 = vmatmul.bf16.vlgmr.msra.gmra.mxu1 %v318_v51  ;;  %v1007_v51 = vld [vmem:[%s1362_s2 + $0x28] sm:$0xf0] }
  0x9e   : > { %v292_v52 = vpop.f32.mrf.mxu0 }
  0x9f   : > { %v1198_v53 = vadd.f32 %v1046_v39, %v292_v52  ;;  %v899_v52 = vor.u32 %v1007_v51, %v898_v48 }
  0xa1   : > { %v299_v56 = vmax.f32 %v1198_v53, 0.0  ;;  %v1015_v53 = vld [vmem:[%s1364_s4 + $0x8] sm:$0xff] }
  0xa6   : > { %v294_v54 = vpop.f32.mrf.mxu0 }
  0xa7   : > { %v1200_v55 = vadd.f32 %v1046_v39, %v294_v54  ;;  %v1009_v39 = vld [vmem:[%s1362_s2 + $0x58] sm:$0xf0]  ;;  %v1023_v54 = vld [vmem:[%s1364_s4 + $0x48] sm:$0xff] }
  0xa8   : > { %v907_v40 = vor.u32 %v1009_v39, %v906_v38  ;;  %743 = vmatpush.bf16.msrb.mxu1 %v1023_v54  ;;  %1036 = vmatpush.bf16.msrb.mxu2 %v1023_v54 }
  0xa9   : > { %v300_v57 = vmax.f32 %v1200_v55, 0.0  ;;  %v1014_v55 = vld [vmem:[%s1364_s4] sm:$0xff] }
  0xaa   : > { %565 = vmatpush.bf16.msra.mxu3 %v907_v40 }
  0xab   : > { %v319_v58 = vpack.c.bf16 %v300_v57, %v299_v56 }
  0xac   : > { %744 = vmatpush.bf16.msrb.mxu1 %v1022_v61  ;;  %1037 = vmatpush.bf16.msrb.mxu2 %v1022_v61 }
  0xad   : > { %384 = vmatmul.bf16.gmra.mxu1 %v319_v58  ;;  %v894_v58 = vld [vmem:[%s1362_s2 + $0x8] sm:$0xf] }
  0xae   : > { %566 = vmatpush.bf16.msra.mxu3 %v903_v45  ;;  %v895_v60 = vor.u32 %v1006_v59, %v894_v58 }
  0xb2   : > { %567 = vmatpush.bf16.msra.mxu3 %v899_v52 }
  0xb6   : > { %568 = vmatpush.bf16.msra.mxu3 %v895_v60 }
 0x11a   : > { %v380_v10 = vpop.f32.mrf.mxu1 }
 0x11b   : > { %v381_v21 = vadd.f32 %v1047_v16, %v380_v10 }
 0x11d   : > { %v390_v28 = vmax.f32 %v381_v21, 0.0 }
 0x122   : > { %v382_v24 = vpop.f32.mrf.mxu1 }
 0x123   : > { %v383_v25 = vadd.f32 %v1047_v16, %v382_v24 }
 0x125   : > { %v391_v29 = vmax.f32 %v383_v25, 0.0 }
 0x127   : > { %v411_v30 = vpack.c.bf16 %v391_v29, %v390_v28 }
 0x129   : > { %472 = vmatmul.bf16.vlgmr.msra.gmra.mxu2 %v411_v30 }
 0x12a   : > { %v385_v31 = vpop.f32.mrf.mxu1 }
 0x12b   : > { %v386_v32 = vadd.f32 %v1047_v16, %v385_v31 }
 0x12d   : > { %v392_v35 = vmax.f32 %v386_v32, 0.0  ;;  %v1050_v32 = vld [vmem:[%s1365_s5] ss:$0 sm:$0xff] }
 0x132   : > { %v387_v33 = vpop.f32.mrf.mxu1 }
 0x133   : > { %v388_v34 = vadd.f32 %v1047_v16, %v387_v33 }
 0x135   : > { %v393_v36 = vmax.f32 %v388_v34, 0.0 }
 0x137   : > { %v412_v37 = vpack.c.bf16 %v393_v36, %v392_v35 }
 0x139   : > { %477 = vmatmul.bf16.gmra.mxu2 %v412_v37 }
 0x1ac   : > { %v473_v62 = vpop.f32.mrf.mxu2 }
 0x1ad   : > { %v474_v2 = vadd.f32 %v1048_v63, %v473_v62 }
 0x1af   : > { %v483_v5 = vmax.f32 %v474_v2, 0.0 }
 0x1b1   : > { %v487_v8 = vadd.f32 %v483_v5, %v297_v49  ;;  %v1017_v49 = vld [vmem:[%s1364_s4 + $0x18] sm:$0xff] }
 0x1b2   : > { %722 = vmatpush.bf16.msrb.mxu0 %v1017_v49 }
 0x1b4   : > { %v475_v4 = vpop.f32.mrf.mxu2 }
 0x1b5   : > { %v476_v6 = vadd.f32 %v1048_v63, %v475_v4 }
 0x1b7   : > { %v484_v7 = vmax.f32 %v476_v6, 0.0 }
 0x1b9   : > { %v488_v9 = vadd.f32 %v484_v7, %v298_v50  ;;  %v1016_v50 = vld [vmem:[%s1364_s4 + $0x10] sm:$0xff] }
 0x1ba   : > { %723 = vmatpush.bf16.msrb.mxu0 %v1016_v50 }
 0x1bb   : > { %v508_v10 = vpack.c.bf16 %v488_v9, %v487_v8 }
 0x1bc   : > { %v478_v11 = vpop.f32.mrf.mxu2 }
 0x1bd   : > { %569 = vmatmul.bf16.vlgmr.msra.gmra.mxu3 %v508_v10  ;;  %745 = vmatmul.bf16.vlgmr.msrb.gmra.mxu1 %v508_v10  ;;  %v479_v12 = vadd.f32 %v1048_v63, %v478_v11 }
 0x1be   : > { %724 = vmatpush.bf16.msrb.mxu0 %v1015_v53 }
 0x1bf   : > { %v485_v14 = vmax.f32 %v479_v12, 0.0 }
 0x1c1   : > { %v489_v17 = vadd.f32 %v485_v14, %v299_v56 }
 0x1c2   : > { %725 = vmatpush.bf16.msrb.mxu0 %v1014_v55 }
 0x1c4   : > { %v480_v13 = vpop.f32.mrf.mxu2 }
 0x1c5   : > { %v481_v15 = vadd.f32 %v1048_v63, %v480_v13 }
 0x1c7   : > { %v486_v16 = vmax.f32 %v481_v15, 0.0 }
 0x1c9   : > { %v490_v18 = vadd.f32 %v486_v16, %v300_v57  ;;  %v1049_v57 = vld [vmem:[%s1363_s3 + $0x3] ss:$0 sm:$0xff] }
 0x1cb   : > { %v509_v43 = vpack.c.bf16 %v490_v18, %v489_v17 }
 0x1cd   : > { %574 = vmatmul.bf16.gmra.mxu3 %v509_v43  ;;  %750 = vmatmul.bf16.vlgmr.msrb.gmra.mxu2 %v509_v43 }
 0x23a   : > { %v746_v33 = vpop.f32.mrf.mxu1 }
 0x240   : > { %v570_v56 = vpop.f32.mrf.mxu3 }
 0x241   : > { %v571_v19 = vadd.f32 %v1049_v57, %v570_v56 }
 0x242   : > { %v748_v39 = vpop.f32.mrf.mxu1 }
 0x243   : > { %v580_v22 = vmax.f32 %v571_v19, 0.0 }
 0x248   : > { %v572_v20 = vpop.f32.mrf.mxu3 }
 0x249   : > { %v573_v21 = vadd.f32 %v1049_v57, %v572_v20 }
 0x24b   : > { %v581_v23 = vmax.f32 %v573_v21, 0.0 }
 0x24d   : > { %v584_v24 = vpack.c.bf16 %v581_v23, %v580_v22 }
 0x24f   : > { %726 = vmatmul.bf16.vlgmr.msrb.gmra.mxu0 %v584_v24 }
 0x250   : > { %v575_v25 = vpop.f32.mrf.mxu3  ;;  %v751_v41 = vpop.f32.mrf.mxu2 }
 0x251   : > { %v576_v26 = vadd.f32 %v1049_v57, %v575_v25 }
 0x253   : > { %v582_v29 = vmax.f32 %v576_v26, 0.0 }
 0x258   : > { %v577_v27 = vpop.f32.mrf.mxu3  ;;  %v753_v51 = vpop.f32.mrf.mxu2 }
 0x259   : > { %v578_v28 = vadd.f32 %v1049_v57, %v577_v27 }
 0x25b   : > { %v583_v30 = vmax.f32 %v578_v28, 0.0 }
 0x25d   : > { %v585_v31 = vpack.c.bf16 %v583_v30, %v582_v29 }
 0x25f   : > { %731 = vmatmul.bf16.gmra.mxu0 %v585_v31 }
 0x2cc   : > { %v727_v34 = vpop.f32.mrf.mxu0 }
 0x2cd   : > { %v728_v35 = vadd.f32 %v1050_v32, %v727_v34 }
 0x2cf   : > { %v747_v36 = vadd.f32 %v746_v33, %v728_v35 }
 0x2d1   : > { %757 = vst.msk [vmem:[%s253_s20] sm:$0xff] %vm756_vm2, %v747_v36 }
 0x2d4   : > { %v729_v37 = vpop.f32.mrf.mxu0 }
 0x2d5   : > { %v730_v38 = vadd.f32 %v1050_v32, %v729_v37 }
 0x2d7   : > { %v749_v40 = vadd.f32 %v748_v39, %v730_v38 }
 0x2d9   : > { %758 = vst.msk [vmem:[%s253_s20 + $0x8] sm:$0xff] %vm756_vm2, %v749_v40 }
 0x2dc   : > { %v732_v42 = vpop.f32.mrf.mxu0 }
 0x2dd   : > { %v733_v44 = vadd.f32 %v1050_v32, %v732_v42 }
 0x2df   : > { %v752_v45 = vadd.f32 %v751_v41, %v733_v44 }
 0x2e1   : > { %759 = vst.msk [vmem:[%s253_s20 + $0x10] sm:$0xff] %vm756_vm2, %v752_v45 }
 0x2e4   : > { %v734_v46 = vpop.f32.mrf.mxu0 }
 0x2e5   : > { %v735_v48 = vadd.f32 %v1050_v32, %v734_v46 }
 0x2e7   : > { %v754_v52 = vadd.f32 %v753_v51, %v735_v48 }
 0x2e9   : > { %760 = vst.msk [vmem:[%s253_s20 + $0x18] sm:$0xff] %vm756_vm2, %v754_v52 }
 0x2ea PF: > { %s16_s21 = sadd.s32 1, %s1057_s21  }
 0x2eb   : > { %p13_p4 = scmp.ge.s32.totalorder %s16_s21, 4  }
 0x2ed   :  { %15 = sbr.rel (!%p13_p4) target bundleno = 1 (0x1), region = 74 }

</bundles_post_ra>
